<compile_context>
chip_gen: v7x
topology: tpu7x:2x2x1
jax: 0.10.0
libtpu: 0.0.40
codegen_flags: <defaults>
</compile_context>

<pallas_src>
import math
import functools

import jax
import jax.numpy as jnp
from jax import lax
from jax.experimental import pallas as pl
from jax.experimental.pallas import tpu as pltpu


# ---------------------------------------------------------------------------
# Helpers
# ---------------------------------------------------------------------------

def _pick_tile(dim: int, base: int) -> int:
    """Largest of {base, base/2, ..., 128} dividing `dim`, else the full dim."""
    t = base
    while t >= 128:
        if dim % t == 0:
            return t
        t //= 2
    return dim


def _pad_dim(x, axis: int, tile_base: int):
    """Pad `axis` to a multiple of 128 when it is large and non-divisible,
    so _pick_tile never falls back to a giant unpipelined block."""
    n = x.shape[axis]
    if n > tile_base and n % 128 != 0:
        pad = [(0, 0)] * x.ndim
        pad[axis] = (0, (-n) % 128)
        x = jnp.pad(x, pad)
    return x, n


def _vmem_limit(block_bytes: int, slack: int = 4 << 20) -> int:
    # Floor: comfortably above v5e's 16 MiB scoped default.
    # Ceiling: below v7x's 64 MiB physical VMEM.
    return int(min(max(block_bytes + slack, 32 << 20), 56 << 20))


# ---------------------------------------------------------------------------
# Tiled linear projection:  y = x @ w + b   (bf16 MXU operands, f32 accumulate)
# ---------------------------------------------------------------------------

def _linear_kernel(x_ref, w_ref, b_ref, o_ref, acc_ref):
    k = pl.program_id(2)

    @pl.when(k == 0)
    def _():
        acc_ref[...] = jnp.zeros_like(acc_ref)

    # bf16 x bf16 -> f32 accumulation: native MXU path on v5e/v6e/v7x.
    acc_ref[...] += jnp.dot(x_ref[...].astype(jnp.bfloat16), w_ref[...],
                            preferred_element_type=jnp.float32)

    @pl.when(k == pl.num_programs(2) - 1)
    def _():
        o_ref[...] = (acc_ref[...] + b_ref[...]).astype(o_ref.dtype)


def linear_pallas(x2d, w, b, *, tm_base=512, tn_base=512, tk_base=512):
    """y = x2d @ w + b with a tiled, pipelined Pallas matmul."""
    x2d, n_orig = _pad_dim(x2d, 0, tm_base)
    n, d_in = x2d.shape
    d_out = w.shape[1]
    # TODO(synk): d_in/d_out that are neither 128-divisible nor small enough
    # for a single block would need padding too; not needed for this module
    # (square d_model x d_model weights).
    tm = _pick_tile(n, tm_base)
    tn = _pick_tile(d_out, tn_base)
    tk = _pick_tile(d_in, tk_base)

    w_bf16 = w.astype(jnp.bfloat16)   # cast once; halves weight DMA bytes
    b2d = b.reshape(1, d_out)

    cost = pl.CostEstimate(
        flops=2 * n * d_in * d_out,
        transcendentals=0,
        bytes_accessed=4 * n * d_in + 2 * d_in * d_out + 4 * n * d_out + 4 * d_out,
    )
    # Double-buffered in/out blocks + the resident f32 accumulator.
    block_bytes = (2 * (tm * tk * 4 + tk * tn * 2 + tn * 4)
                   + 2 * tm * tn * 4 + tm * tn * 4)

    out = pl.pallas_call(
        _linear_kernel,
        out_shape=jax.ShapeDtypeStruct((n, d_out), jnp.float32),
        grid_spec=pltpu.PrefetchScalarGridSpec(
            num_scalar_prefetch=0,
            grid=(n // tm, d_out // tn, d_in // tk),
            in_specs=[
                pl.BlockSpec((tm, tk), lambda i, j, k: (i, k)),
                pl.BlockSpec((tk, tn), lambda i, j, k: (k, j)),
                pl.BlockSpec((1, tn), lambda i, j, k: (0, j)),
            ],
            out_specs=pl.BlockSpec((tm, tn), lambda i, j, k: (i, j)),
            scratch_shapes=[pltpu.VMEM((tm, tn), jnp.float32)],
        ),
        compiler_params=pltpu.CompilerParams(
            dimension_semantics=("parallel", "parallel", "arbitrary"),
            vmem_limit_bytes=_vmem_limit(block_bytes)),
        cost_estimate=cost,
    )(x2d, w_bf16, b2d)

    return out if n == n_orig else out[:n_orig]


# ---------------------------------------------------------------------------
# Multi-head scaled dot-product attention (head split inside the kernel)
# ---------------------------------------------------------------------------

def _mha_attention_kernel(q_ref, k_ref, v_ref, ctx_ref, attn_ref, *,
                          num_heads, d_head):
    # q_ref: (1, tq, D); k_ref / v_ref: (1, Lk, D)
    # ctx_ref: (1, tq, D); attn_ref: (H, 1, tq, Lk)
    dh = d_head
    q = q_ref[0]          # (tq, D); 1/sqrt(d_model) already folded into W_q
    k = k_ref[0]          # (Lk, D)
    v = v_ref[0]          # (Lk, D)

    ctx_parts = []
    for h in range(num_heads):        # static unroll; lane slices are static
        lo, hi = h * dh, (h + 1) * dh
        qh = q[:, lo:hi]              # (tq, dh)
        kh = k[:, lo:hi]              # (Lk, dh)
        vh = v[:, lo:hi]              # (Lk, dh)

        # (tq, Lk) scores; contract last dims -> no explicit k.T transpose.
        s = lax.dot_general(qh, kh, (((1,), (1,)), ((), ())),
                            preferred_element_type=jnp.float32)
        m = jnp.max(s, axis=-1, keepdims=True)
        e = jnp.exp(s - m)
        denom = jnp.sum(e, axis=-1, keepdims=True)
        attn_h = e * pl.reciprocal(denom, approx=True)   # EUP reciprocal

        # Write this head's attention tile now (full-Lk lanes, dense) so the
        # big (tq, Lk) temporaries die within the head iteration.
        attn_ref[h, 0, :, :] = attn_h.astype(attn_ref.dtype)

        ctx_parts.append(jnp.dot(attn_h, vh, preferred_element_type=jnp.float32))

    # Single lane-dense, full-width (tq, D) context store
    # (instead of H masked sub-128-lane stores).
    ctx_ref[0, :, :] = jnp.concatenate(ctx_parts, axis=-1).astype(ctx_ref.dtype)


def mha_attention_pallas(q, k, v, *, num_heads, tq_base=128,
                         attn_dtype=jnp.float32):
    """q/k/v: (B, L, D) projected tensors (query already pre-scaled).

    Returns context (B, Lq, D) and attn (H*B, Lq, Lk), head-major, matching
    the PyTorch reference's permute(2,0,1,3).view(B*H, ...) ordering.
    """
    assert k.shape == v.shape, "key and value must share (B, Lk, D)"
    B, Lq_orig, D = q.shape
    Lk = k.shape[1]
    H = num_heads
    dh = D // H

    q, _ = _pad_dim(q, 1, tq_base)     # harden: keep tq pipelineable
    Lq = q.shape[1]
    tq = _pick_tile(Lq, tq_base)

    kernel = functools.partial(_mha_attention_kernel, num_heads=H, d_head=dh)

    attn_isize = jnp.dtype(attn_dtype).itemsize
    cost = pl.CostEstimate(
        flops=4 * B * H * Lq * Lk * dh,
        transcendentals=B * H * Lq * Lk,
        bytes_accessed=(4 * (2 * B * Lq * D + 2 * B * Lk * D)
                        + attn_isize * H * B * Lq * Lk),
    )
    # Double-buffered blocks + a few live (tq, Lk) f32 temporaries.
    block_bytes = (2 * (tq * D * 4 + 2 * Lk * D * 4 + tq * D * 4
                        + H * tq * Lk * attn_isize)
                   + 3 * tq * Lk * 4)

    ctx, attn = pl.pallas_call(
        kernel,
        out_shape=(
            jax.ShapeDtypeStruct((B, Lq, D), jnp.float32),
            jax.ShapeDtypeStruct((H, B, Lq, Lk), attn_dtype),
        ),
        grid_spec=pltpu.PrefetchScalarGridSpec(
            num_scalar_prefetch=0,
            grid=(B, Lq // tq),
            in_specs=[
                pl.BlockSpec((1, tq, D), lambda b, qi: (b, qi, 0)),
                # K/V block indices only change with b -> not re-DMA'd per qi.
                pl.BlockSpec((1, Lk, D), lambda b, qi: (b, 0, 0)),
                pl.BlockSpec((1, Lk, D), lambda b, qi: (b, 0, 0)),
            ],
            out_specs=(
                pl.BlockSpec((1, tq, D), lambda b, qi: (b, qi, 0)),
                pl.BlockSpec((H, 1, tq, Lk), lambda b, qi: (0, b, qi, 0)),
            ),
        ),
        compiler_params=pltpu.CompilerParams(
            dimension_semantics=("parallel", "parallel"),
            vmem_limit_bytes=_vmem_limit(block_bytes)),
        cost_estimate=cost,
    )(q, k, v)

    if Lq != Lq_orig:
        ctx = ctx[:, :Lq_orig]
        attn = attn[:, :, :Lq_orig]
    # (H, B, Lq, Lk) -> (H*B, Lq, Lk): contiguous reshape, no data movement.
    return ctx, attn.reshape(H * B, Lq_orig, Lk)


# ---------------------------------------------------------------------------
# Module wrapper (glue in plain JAX)
# ---------------------------------------------------------------------------

class MultiHeadAttentionPallas:
    def __init__(self, d_model: int, num_heads: int, key):
        assert d_model % num_heads == 0
        self.d_model = d_model
        self.num_heads = num_heads
        self.d_head = d_model // num_heads
        self.sqrt_dim = math.sqrt(d_model)  # reference scales by sqrt(d_model)

        ks = jax.random.split(key, 6)
        scale = 1.0 / math.sqrt(d_model)
        # weights stored as (d_in, d_out); equivalent to torch Linear's W.T
        self.wq = jax.random.uniform(ks[0], (d_model, d_model), jnp.float32, -scale, scale)
        self.bq = jax.random.uniform(ks[1], (d_model,), jnp.float32, -scale, scale)
        self.wk = jax.random.uniform(ks[2], (d_model, d_model), jnp.float32, -scale, scale)
        self.bk = jax.random.uniform(ks[3], (d_model,), jnp.float32, -scale, scale)
        self.wv = jax.random.uniform(ks[4], (d_model, d_model), jnp.float32, -scale, scale)
        self.bv = jax.random.uniform(ks[5], (d_model,), jnp.float32, -scale, scale)

        # Fold the 1/sqrt(d_model) attention scale into the query projection
        # (zero-cost constant fold; removes per-tile VPU multiplies).
        inv = 1.0 / self.sqrt_dim
        self.wq_scaled = self.wq * inv
        self.bq_scaled = self.bq * inv

    def __call__(self, query, key, value):
        B, Lq, D = query.shape
        Lk = key.shape[1]
        Lv = value.shape[1]
        assert Lk == Lv, "key and value sequence lengths must match"

        q = linear_pallas(query.reshape(B * Lq, D), self.wq_scaled,
                          self.bq_scaled).reshape(B, Lq, D)
        k = linear_pallas(key.reshape(B * Lk, D), self.wk, self.bk).reshape(B, Lk, D)
        v = linear_pallas(value.reshape(B * Lv, D), self.wv, self.bv).reshape(B, Lv, D)

        return mha_attention_pallas(q, k, v, num_heads=self.num_heads)


# ---------------------------------------------------------------------------
# Pure-JAX references (for correctness checks)
# ---------------------------------------------------------------------------

def reference_mha(mha: MultiHeadAttentionPallas, query, key, value, *,
                  match_kernel_precision=False):
    B, Lq, D = query.shape
    Lk = key.shape[1]
    H, dh = mha.num_heads, mha.d_head

    def proj(x, w, b):
        if match_kernel_precision:
            return jnp.dot(x.astype(jnp.bfloat16), w.astype(jnp.bfloat16),
                           preferred_element_type=jnp.float32) + b
        return x @ w + b

    if match_kernel_precision:
        q = proj(query.reshape(-1, D), mha.wq_scaled, mha.bq_scaled)
        score_scale = 1.0           # scale already folded into W_q
    else:
        q = proj(query.reshape(-1, D), mha.wq, mha.bq)
        score_scale = 1.0 / mha.sqrt_dim
    k = proj(key.reshape(-1, D), mha.wk, mha.bk)
    v = proj(value.reshape(-1, D), mha.wv, mha.bv)

    q = q.reshape(B, Lq, H, dh).transpose(2, 0, 1, 3).reshape(H * B, Lq, dh)
    k = k.reshape(B, Lk, H, dh).transpose(2, 0, 1, 3).reshape(H * B, Lk, dh)
    v = v.reshape(B, Lk, H, dh).transpose(2, 0, 1, 3).reshape(H * B, Lk, dh)
    score = jnp.einsum("bqd,bkd->bqk", q, k) * score_scale
    attn = jax.nn.softmax(score, axis=-1)
    ctx = jnp.einsum("bqk,bkd->bqd", attn, v)
    ctx = ctx.reshape(H, B, Lq, dh).transpose(1, 2, 0, 3).reshape(B, Lq, H * dh)
    return ctx, attn


# ---------------------------------------------------------------------------
# Main
# ---------------------------------------------------------------------------

if __name__ == "__main__":
    d_model = 32
    num_heads = 4
    batch = 2
    q_len = 8
    v_len = 8

    root = jax.random.PRNGKey(0)
    k_params, k_q, k_k, k_v = jax.random.split(root, 4)

    mha = MultiHeadAttentionPallas(d_model, num_heads, k_params)

    query = jax.random.normal(k_q, (batch, q_len, d_model), jnp.float32)
    key = jax.random.normal(k_k, (batch, v_len, d_model), jnp.float32)
    value = jax.random.normal(k_v, (batch, v_len, d_model), jnp.float32)

    context, attn = mha(query, key, value)
    context = jax.block_until_ready(context)
    attn = jax.block_until_ready(attn)

    assert context.shape == (batch, q_len, d_model)
    assert attn.shape == (num_heads * batch, q_len, v_len)

    # Tight check vs. a reference mimicking the kernel's bf16 MXU operands.
    ref_ctx_m, ref_attn_m = reference_mha(mha, query, key, value,
                                          match_kernel_precision=True)
    assert jnp.allclose(context, ref_ctx_m, rtol=1e-2, atol=1e-2), \
        float(jnp.max(jnp.abs(context - ref_ctx_m)))
    assert jnp.allclose(attn, ref_attn_m, rtol=1e-2, atol=1e-2), \
        float(jnp.max(jnp.abs(attn - ref_attn_m)))

    # Loose check vs. the true f32 reference (bf16 MXU operands + approx
    # reciprocal shift the result slightly; tolerance loosened per review).
    ref_ctx, ref_attn = reference_mha(mha, query, key, value)
    assert jnp.allclose(context, ref_ctx, rtol=3e-2, atol=3e-2), \
        float(jnp.max(jnp.abs(context - ref_ctx)))
    assert jnp.allclose(attn, ref_attn, rtol=3e-2, atol=2e-2), \
        float(jnp.max(jnp.abs(attn - ref_attn)))

    print("KERNEL_OK")
</pallas_src>

<mosaic_0001>
module attributes {stable_mosaic.version = 11 : i64} {
  func.func @_linear_kernel(%arg0: i32, %arg1: i32, %arg2: i32, %arg3: memref<16x32xf32, #tpu.memory_space<vmem>>, %arg4: memref<32x32xbf16, #tpu.memory_space<vmem>>, %arg5: memref<1x32xf32, #tpu.memory_space<vmem>>, %arg6: memref<16x32xf32, #tpu.memory_space<vmem>>, %arg7: memref<16x32xf32, #tpu.memory_space<vmem>>) attributes {dimension_semantics = [#tpu.dimension_semantics<parallel>, #tpu.dimension_semantics<parallel>, #tpu.dimension_semantics<arbitrary>], iteration_bounds = array<i64: 1, 1, 1>, scalar_prefetch = 0 : i64, scratch_operands = 1 : i64, tpu.core_type = #tpu.core_type<tc>, window_params = [{transform_indices = @transform_0, window_bounds = array<i64: 16, 32>}, {transform_indices = @transform_1, window_bounds = array<i64: 32, 32>}, {transform_indices = @transform_2, window_bounds = array<i64: 1, 32>}, {transform_indices = @transform_3, window_bounds = array<i64: 16, 32>}]} {
    %c0_i32 = arith.constant 0 : i32
    %0 = arith.cmpi eq, %arg2, %c0_i32 : i32
    %1 = arith.extui %0 : i1 to i32
    %c0_i32_0 = arith.constant 0 : i32
    %2 = arith.cmpi ne, %1, %c0_i32_0 : i32
    scf.if %2 {
      %cst_10 = arith.constant 0.000000e+00 : f32
      %13 = vector.broadcast %cst_10 : f32 to vector<16x32xf32>
      %c0_11 = arith.constant 0 : index
      %c0_12 = arith.constant 0 : index
      %14 = vector.load %arg7[%c0_11, %c0_12] : memref<16x32xf32, #tpu.memory_space<vmem>>, vector<16x32xf32>
      tpu.vector_store %arg7[%c0_11, %c0_12], %13 {strides = array<i32>} : memref<16x32xf32, #tpu.memory_space<vmem>>, vector<16x32xf32>,
    } else {
    }
    %c0 = arith.constant 0 : index
    %c0_1 = arith.constant 0 : index
    %3 = vector.load %arg7[%c0, %c0_1] : memref<16x32xf32, #tpu.memory_space<vmem>>, vector<16x32xf32>
    %c0_2 = arith.constant 0 : index
    %c0_3 = arith.constant 0 : index
    %4 = vector.load %arg3[%c0_2, %c0_3] : memref<16x32xf32, #tpu.memory_space<vmem>>, vector<16x32xf32>
    %5 = arith.truncf %4 : vector<16x32xf32> to vector<16x32xbf16>
    %c0_4 = arith.constant 0 : index
    %c0_5 = arith.constant 0 : index
    %6 = vector.load %arg4[%c0_4, %c0_5] : memref<32x32xbf16, #tpu.memory_space<vmem>>, vector<32x32xbf16>
    %cst = arith.constant dense<0.000000e+00> : vector<16x32xf32>
    %7 = tpu.matmul %5, %6, %cst {dimension_numbers = #tpu.dot_dimension_numbers<[1], [0], [0], [1], [0, 0, 1, 1], [], []>} : vector<16x32xbf16>, vector<32x32xbf16>, vector<16x32xf32> -> vector<16x32xf32>
    %8 = arith.addf %3, %7 : vector<16x32xf32>
    %c0_6 = arith.constant 0 : index
    %c0_7 = arith.constant 0 : index
    %9 = vector.load %arg7[%c0_6, %c0_7] : memref<16x32xf32, #tpu.memory_space<vmem>>, vector<16x32xf32>
    tpu.vector_store %arg7[%c0_6, %c0_7], %8 {strides = array<i32>} : memref<16x32xf32, #tpu.memory_space<vmem>>, vector<16x32xf32>,
    %c0_i32_8 = arith.constant 0 : i32
    %10 = arith.cmpi eq, %arg2, %c0_i32_8 : i32
    %11 = arith.extui %10 : i1 to i32
    %c0_i32_9 = arith.constant 0 : i32
    %12 = arith.cmpi ne, %11, %c0_i32_9 : i32
    scf.if %12 {
      %c0_10 = arith.constant 0 : index
      %c0_11 = arith.constant 0 : index
      %13 = vector.load %arg7[%c0_10, %c0_11] : memref<16x32xf32, #tpu.memory_space<vmem>>, vector<16x32xf32>
      %c0_12 = arith.constant 0 : index
      %c0_13 = arith.constant 0 : index
      %14 = vector.load %arg5[%c0_12, %c0_13] : memref<1x32xf32, #tpu.memory_space<vmem>>, vector<1x32xf32>
      %15 = vector.broadcast %14 : vector<1x32xf32> to vector<16x32xf32>
      %16 = arith.addf %13, %15 : vector<16x32xf32>
      %c0_14 = arith.constant 0 : index
      %c0_15 = arith.constant 0 : index
      %17 = vector.load %arg6[%c0_14, %c0_15] : memref<16x32xf32, #tpu.memory_space<vmem>>, vector<16x32xf32>
      tpu.vector_store %arg6[%c0_14, %c0_15], %16 {strides = array<i32>} : memref<16x32xf32, #tpu.memory_space<vmem>>, vector<16x32xf32>,
    } else {
    }
    return
  }
  func.func @transform_0(%arg0: i32, %arg1: i32, %arg2: i32) -> (i32, i32) {
    %c0_i32 = arith.constant 0 : i32
    return %arg0, %arg2 : i32, i32
  }
  func.func @transform_1(%arg0: i32, %arg1: i32, %arg2: i32) -> (i32, i32) {
    %c0_i32 = arith.constant 0 : i32
    return %arg2, %arg1 : i32, i32
  }
  func.func @transform_2(%arg0: i32, %arg1: i32, %arg2: i32) -> (i32, i32) {
    %c0_i32 = arith.constant 0 : i32
    %c0_i32_0 = arith.constant 0 : i32
    return %c0_i32, %arg1 : i32, i32
  }
  func.func @transform_3(%arg0: i32, %arg1: i32, %arg2: i32) -> (i32, i32) {
    %c0_i32 = arith.constant 0 : i32
    return %arg0, %arg1 : i32, i32
  }
}

</mosaic_0001>

<bundles_post_ra>
// kernel: tpu_custom_call.1
= control target key start
LH: loop header
LB: loop body
LE: loop exit
PB: predicated region body
PF: predicated region fallthrough
CT: control target
= control target key end

     0   :  { %8 = vsyncpa [#allocation4], 0  ;;  %s334_s0 = inlined_call_operand.hbm [shape: f32[16,32], index: 0, kind: input, shape index: {}]   ;;  %s335_s1 = inlined_call_operand.hbm [shape: bf16[32,32], index: 1, kind: input, shape index: {}]   ;;  %s336_s2 = inlined_call_operand.vmem [shape: f32[1,32], index: 2, kind: input, shape index: {}]   ;;  %s337_s3 = inlined_call_operand.hbm [shape: f32[16,32], index: 3, kind: output, shape index: {}]  }
   0x1   :  { %9 = vsyncpa [#allocation7], 0 }
   0x2   :  { %10 = vsyncpa [#allocation5], 0  ;;  %s253_s12 = smov [#allocation3]   ;;  %s181_s16 = scalar_lea.hbm %s334_s0, 256 }
   0x3   :  { %s16_s13 = sshll.u32 %s253_s12, 4  ;;  %p182_p0 = scmp.ne.s32.totalorder %s334_s0, %s181_s16  ;;  %s17_s13 = int_to_ptr.vmem [resolvable:$true] %s16_s13 }
   0x4   :  { %p185_p1 = scmp.lt.u32.totalorder %s181_s16, %s334_s0 }
   0x6   :  { %p187_p2 = pnand %p185_p1, %p182_p0 }
   0x8   :  { %190 = shalt.err (!%p187_p2)
}
   0x9   :  { %s191_s21 = scalar_lea.vmem %s17_s13, 256  ;;  %p196_p4 = scmp.lt.s32.totalorder %s17_s13, %s17_s13 }
   0xa   :  { %p192_p3 = scmp.ne.s32.totalorder %s17_s13, %s191_s21  ;;  %p197_p5 = scmp.lt.s32.totalorder %s191_s21, %s191_s21 }
   0xc   :  { %p198_p6 = por %p197_p5, %p196_p4 }
   0xe   :  { %p199_p7 = pnand %p198_p6, %p192_p3 }
  0x10   :  { %202 = shalt.err (!%p199_p7)
}
  0x11   :  { %s254_s22 = smov 128   ;;  %s255_s23 = smov 8  }
  0x12   :  { %22 = dma.hbm_to_vmem [thread:$0]  %s334_s0, 256, %s17_s13, [#allocation4], %s254_s22, %s254_s22, %s255_s23  }
  0x13   :  { %s256_s26 = smov [#allocation6]   ;;  %s203_s30 = scalar_lea.hbm %s335_s1, 256 }
  0x14   :  { %s28_s27 = sshll.u32 %s256_s26, 4  ;;  %p204_p8 = scmp.ne.s32.totalorder %s335_s1, %s203_s30  ;;  %s29_s27 = int_to_ptr.vmem [resolvable:$true] %s28_s27 }
  0x15   :  { %p207_p9 = scmp.lt.u32.totalorder %s203_s30, %s335_s1 }
  0x17   :  { %p209_p10 = pnand %p207_p9, %p204_p8 }
  0x19   :  { %212 = shalt.err (!%p209_p10)
}
  0x1a   :  { %s213_s8 = scalar_lea.vmem %s29_s27, 256  ;;  %p218_p12 = scmp.lt.s32.totalorder %s29_s27, %s29_s27 }
  0x1b   :  { %p214_p11 = scmp.ne.s32.totalorder %s29_s27, %s213_s8  ;;  %p219_p13 = scmp.lt.s32.totalorder %s213_s8, %s213_s8 }
  0x1d   :  { %p220_p0 = por %p219_p13, %p218_p12 }
  0x1f   :  { %p221_p1 = pnand %p220_p0, %p214_p11 }
  0x21   :  { %224 = shalt.err (!%p221_p1)
}
  0x22   :  { %s257_s0 = smov 64   ;;  %s258_s9 = smov 4  }
  0x23   :  { %34 = dma.hbm_to_vmem [thread:$0]  %s335_s1, 256, %s29_s27, [#allocation7], %s257_s0, %s257_s0, %s258_s9  }
  0x24   :  { %247 = dma.done.wait [#allocation4], 256  }
  0x25   :  { %248 = vsyncadd [#allocation4], 4294967040 }
  0x26   :  { %249 = dma.done.wait [#allocation7], 256  }
  0x27   :  { %250 = vsyncadd [#allocation7], 4294967040  ;;  %vm48_vm0 = vcmask 261120   ;;  %v259_v0 = vmov 0.0   ;;  %vm260_vm1 = vmmov 0   ;;  %v179_v1 = vld [vmem:[#allocation6] sm:$0xff]  }
  0x28   :  { %162 = vmatprep.subr.bf16.mxu0 %v259_v0  ;;  %166 = vmatprep.mubr.msk.bf16.mxu0 %vm260_vm1, %v259_v0  ;;  %49 = vst.msk [vmem:[#allocation2] sm:$0xff] %vm48_vm0, %v259_v0  ;;  %50 = vst.msk [vmem:[#allocation2 + $0x8] sm:$0xff] %vm48_vm0, %v259_v0  ;;  %v180_v2 = vld [vmem:[#allocation6 + $0x8] sm:$0xff]   ;;  %v53_v3 = vld [vmem:[#allocation3] sm:$0xff]  ;;  %s261_s13 = smov [#allocation8]  }
  0x29   :  { %163 = vmatpush3.bf16.msra.mxu0 %v179_v1  ;;  %v54_v4 = vld [vmem:[#allocation3 + $0x8] sm:$0xff]  ;;  %v158_v14 = vld [vmem:[%s336_s2] ss:$0 sm:$0xff]  ;;  %s142_s14 = sshll.u32 %s261_s13, 4  ;;  %s143_s14 = int_to_ptr.vmem [resolvable:$true] %s142_s14 }
  0x2a   :  { %164 = vmatprep.subr.bf16.mxu0 %v259_v0  ;;  %v55_v5 = vpack.c.bf16 %v54_v4, %v53_v3  ;;  %s225_s15 = scalar_lea.vmem %s143_s14, 256  ;;  %p230_p3 = scmp.lt.s32.totalorder %s143_s14, %s143_s14 }
  0x2b   :  { %p226_p2 = scmp.ne.s32.totalorder %s143_s14, %s225_s15  ;;  %p231_p4 = scmp.lt.s32.totalorder %s225_s15, %s225_s15 }
  0x2d   :  { %165 = vmatpush3.bf16.msra.mxu0 %v180_v2  ;;  %p232_p5 = por %p231_p4, %p230_p3 }
  0x2f   :  { %v51_v6 = vld [vmem:[#allocation2] sm:$0xff]  ;;  %v52_v8 = vld [vmem:[#allocation2 + $0x8] sm:$0xff]  ;;  %p233_p6 = pnand %p232_p5, %p226_p2 }
  0x30   :  { %167 = vmatmul.mubr.msk.bf16.vlgmr.msra.gmra.mrb[0].mxu0 %vm48_vm0, %v55_v5 }
 0x103   :  { %v110_v7 = vpop.f32.mrb[0].mxu0 }
 0x104   :  { %v117_v9 = vadd.f32 %v110_v7, %v51_v6  ;;  %v168_v10 = vpop.f32.mrb[1].mxu0 }
 0x105   :  { %v113_v11 = vpop.f32.mrb[2].mxu0 }
 0x106   :  { %119 = vst.msk [vmem:[#allocation2] sm:$0xff] %vm48_vm0, %v117_v9  ;;  %v118_v12 = vadd.f32 %v113_v11, %v52_v8  ;;  %v169_v13 = vpop.f32.mrb[3].mxu0 }
 0x108   :  { %120 = vst.msk [vmem:[#allocation2 + $0x8] sm:$0xff] %vm48_vm0, %v118_v12 }
 0x10d   :  { %v124_v15 = vld [vmem:[#allocation2] sm:$0xff] }
 0x10e   :  { %v133_v16 = vadd.f32 %v158_v14, %v124_v15 }
 0x10f   :  { %v125_v17 = vld [vmem:[#allocation2 + $0x8] sm:$0xff] }
 0x110   :  { %v134_v18 = vadd.f32 %v158_v14, %v125_v17  ;;  %135 = vst.msk [vmem:[#allocation8] sm:$0xff] %vm48_vm0, %v133_v16 }
 0x112   :  { %136 = vst.msk [vmem:[#allocation8 + $0x8] sm:$0xff] %vm48_vm0, %v134_v18 }
 0x113   :  { %236 = shalt.err (!%p233_p6)
}
 0x114   :  { %s237_s17 = scalar_lea.hbm %s337_s3, 256 }
 0x115   :  { %p238_p7 = scmp.ne.s32.totalorder %s337_s3, %s237_s17  ;;  %p241_p8 = scmp.lt.u32.totalorder %s237_s17, %s337_s3 }
 0x117   :  { %p243_p9 = pnand %p241_p8, %p238_p7 }
 0x119   :  { %246 = shalt.err (!%p243_p9)
}
 0x11a   :  { %148 = dma.vmem_to_hbm [thread:$0]  %s143_s14, 256, %s337_s3, [#allocation5], %s254_s22, %s254_s22, %s255_s23  }
 0x11b   :  { %251 = dma.done.wait [#allocation5], 256  }
 0x11c   :  { %252 = vsyncadd [#allocation5], 4294967040 }
 0x11d   :  { %152 = vsyncpa [#allocation4], 1 }
 0x11e   :  { %153 = vsyncpa [#allocation7], 1 }
 0x11f   :  { %154 = vsyncpa [#allocation5], 1 }

</bundles_post_ra>
